<compile_context>
chip_gen: v7x
topology: tpu7x:2x2x1
jax: 0.10.0
libtpu: 0.0.40
codegen_flags: <defaults>
</compile_context>

<pallas_src>
import functools
import math

import jax
import jax.numpy as jnp
from jax import lax
from jax.experimental import pallas as pl
from jax.experimental.pallas import tpu as pltpu

LANES = 128
SUBLANES = 8
ACC_ROWS = SUBLANES                  # (8, 128) f32 == one vreg accumulator
TARGET_TILE_BYTES = 4 * 1024 * 1024  # ~4 MiB per input per grid step
MIN_KERNEL_BYTES = 1 * 1024 * 1024   # below this (per input), plain jnp wins
VMEM_LIMIT_BYTES = 32 * 1024 * 1024  # 2 in x 2 buf x 4 MiB = 16 MiB + headroom


def _cdiv(a, b):
    return -(-a // b)


def _round_up(x, m):
    return ((x + m - 1) // m) * m


@functools.lru_cache(maxsize=1)
def _tensorcores_per_chip():
    """Best-effort TensorCores-per-chip detection (2 on v7x, 1 on v5e/v6e)."""
    try:
        info = pltpu.get_tpu_info()
        for attr in ("num_cores", "num_tensorcores", "cores_per_chip",
                     "core_count"):
            v = getattr(info, attr, None)
            if isinstance(v, int) and v > 0:
                return v
    except Exception:
        pass
    try:
        dev = jax.devices()[0]
        v = getattr(dev, "num_cores", None)
        if isinstance(v, int) and v > 0:
            return v
        kind = str(getattr(dev, "device_kind", "")).lower()
        if "7" in kind:
            return 2
    except Exception:
        pass
    return 1


def _mse_partial_kernel(pred_ref, tgt_ref, out_ref, acc_ref, *,
                        block_rows, steps_per_partial, valid_rows, rem):
    """One 'partial' = inner (arbitrary) reduction over its share of the rows.

    Grid: (num_partials [parallel], steps_per_partial [arbitrary]).
    acc_ref : VMEM (8, 128) f32 running sum (one vreg).
    out_ref : (1, 8, 128) per-partial folded partial sums.
    """
    p = pl.program_id(0)
    s = pl.program_id(1)

    @pl.when(s == 0)
    def _():
        acc_ref[...] = jnp.zeros_like(acc_ref)

    # Pure VPU work per step: sub, mul over the whole block, then a fold of
    # block_rows//8 vregs into the single accumulator vreg.
    d = pred_ref[...].astype(jnp.float32) - tgt_ref[...].astype(jnp.float32)
    sq = d * d

    def _fold(x):
        return jnp.sum(x.reshape(block_rows // SUBLANES, SUBLANES, LANES),
                       axis=0)

    # First global row covered by this block (static-shape arithmetic on
    # traced program ids; valid_rows / rem are baked-in Python ints).
    r0 = (p * steps_per_partial + s) * block_rows
    needs_mask = r0 + block_rows > valid_rows

    @pl.when(jnp.logical_not(needs_mask))
    def _():
        acc_ref[...] += _fold(sq)

    @pl.when(needs_mask)
    def _():
        # Boundary block: zero out rows/lanes past the valid element count
        # (covers both the grid edge and the <128-element lane tail).
        row_ids = r0 + lax.broadcasted_iota(jnp.int32, (block_rows, LANES), 0)
        lane_ids = lax.broadcasted_iota(jnp.int32, (block_rows, LANES), 1)
        valid = (row_ids < valid_rows) | ((row_ids == valid_rows)
                                          & (lane_ids < rem))
        acc_ref[...] += _fold(jnp.where(valid, sq, 0.0))

    @pl.when(s == pl.num_programs(1) - 1)
    def _():
        out_ref[...] = acc_ref[...].reshape(out_ref.shape)


def mse_loss_pallas(pred, target, *, target_tile_bytes=TARGET_TILE_BYTES,
                    min_kernel_bytes=MIN_KERNEL_BYTES):
    """Mean squared error between `pred` and `target` (any matching shape)."""
    assert pred.shape == target.shape, (pred.shape, target.shape)
    total_n = int(pred.size)
    if total_n == 0:
        return jnp.float32(0.0)

    itemsize = max(jnp.dtype(pred.dtype).itemsize,
                   jnp.dtype(target.dtype).itemsize)

    # Small inputs: launch/pipeline-fill overhead dominates; XLA's fused
    # reduction is faster and avoids all plumbing.
    if total_n * itemsize < min_kernel_bytes:
        d = pred.astype(jnp.float32) - target.astype(jnp.float32)
        return jnp.mean(d * d)

    # --- tiling decisions (all static Python ints) ---------------------------
    rows = _cdiv(total_n, LANES)
    valid_rows, rem = divmod(total_n, LANES)

    # Sublane alignment by dtype packing: 8 rows (f32), 16 (bf16), 32 (int8/fp8).
    row_align = SUBLANES * max(1, 4 // itemsize)
    block_rows = max(row_align,
                     (target_tile_bytes // (LANES * itemsize))
                     // row_align * row_align)
    block_rows = min(block_rows, _round_up(rows, row_align))
    steps = _cdiv(rows, block_rows)

    # Megacore split only where it can land on a second TensorCore (v7x).
    # TODO(synk): consider pltpu.CORE_PARALLEL / pl.core_map if xprof shows the
    #             leading "parallel" axis not sharding across the two TCs.
    num_partials = 2 if (_tensorcores_per_chip() >= 2 and steps >= 2) else 1
    steps_per_partial = _cdiv(steps, num_partials)

    # --- lane-dense 2-D slabs, no full-tensor pad -----------------------------
    lane_pad = (-total_n) % LANES  # <=127 elements; only for ragged numel

    def _prep(x):
        x = x.reshape(-1)
        if lane_pad:
            x = jnp.pad(x, (0, lane_pad))
        return x.reshape(rows, LANES)  # free (bitcast) when lane_pad == 0

    pred2d = _prep(pred)
    tgt2d = _prep(target)

    in_map = lambda p, s: (p * steps_per_partial + s, 0)

    kernel = functools.partial(
        _mse_partial_kernel,
        block_rows=block_rows,
        steps_per_partial=steps_per_partial,
        valid_rows=valid_rows,
        rem=rem,
    )

    tile_bytes = block_rows * LANES * itemsize
    partials = pl.pallas_call(
        kernel,
        out_shape=jax.ShapeDtypeStruct((num_partials, SUBLANES, LANES),
                                       jnp.float32),
        grid_spec=pltpu.PrefetchScalarGridSpec(
            num_scalar_prefetch=0,
            grid=(num_partials, steps_per_partial),
            in_specs=[
                pl.BlockSpec((block_rows, LANES), in_map),
                pl.BlockSpec((block_rows, LANES), in_map),
            ],
            out_specs=pl.BlockSpec((1, SUBLANES, LANES),
                                   lambda p, s: (p, 0, 0)),
            scratch_shapes=[pltpu.VMEM((ACC_ROWS, LANES), jnp.float32)],
        ),
        compiler_params=pltpu.CompilerParams(
            dimension_semantics=("parallel", "arbitrary"),
            vmem_limit_bytes=max(VMEM_LIMIT_BYTES, 8 * tile_bytes),
        ),
        cost_estimate=pl.CostEstimate(
            flops=3 * total_n,
            transcendentals=0,
            bytes_accessed=total_n * (jnp.dtype(pred.dtype).itemsize
                                      + jnp.dtype(target.dtype).itemsize)
            + num_partials * SUBLANES * LANES * 4,
        ),
    )(pred2d, tgt2d)

    # Tiny cross-partial / cross-lane reduce + scale by precomputed 1/N.
    return jnp.sum(partials) * jnp.float32(1.0 / total_n)


class LossPallas:
    """JAX analogue of Models.LOSS: dispatches to the concrete loss kernel."""

    def __init__(self, config):
        self.config = config
        # The torch module would do:
        #   loss_module = getattr(importlib.import_module('Models.' + name),
        #                         'loss_func')
        #   self.loss = loss_module(config)
        # Here the concrete loss is the Pallas MSE kernel above.
        self.loss = lambda data_batch, training_output: mse_loss_pallas(
            training_output, data_batch["target"]
        )

    def __call__(self, data_batch, training_output):
        return self.loss(data_batch, training_output)


if __name__ == "__main__":
    key = jax.random.PRNGKey(0)
    k1, k2 = jax.random.split(key)

    # Small NCHW shapes consistent with the module's usage.
    B, C, H, W = 2, 4, 16, 16
    target = jax.random.normal(k1, (B, C, H, W), dtype=jnp.float32)
    training_output = jax.random.normal(k2, (B, C, H, W), dtype=jnp.float32)

    config = {"model": {"name": "synthetic"}}
    loss_fn = LossPallas(config)

    # 1) Dispatcher path (small tensors take the fused-jnp fast path).
    data_batch = {"target": target}
    loss = jax.block_until_ready(loss_fn(data_batch, training_output))
    ref = jnp.mean((training_output - target) ** 2)
    assert jnp.allclose(loss, ref, rtol=1e-5, atol=1e-6), (loss, ref)

    # 2) Force the Pallas kernel on the same (lane-aligned) small shape.
    loss_k = jax.block_until_ready(
        mse_loss_pallas(training_output, target, min_kernel_bytes=0))
    assert jnp.allclose(loss_k, ref, rtol=1e-5, atol=1e-6), (loss_k, ref)

    # 3) Ragged shape (numel not a multiple of 128) through the kernel path.
    t2 = jax.random.normal(k1, (3, 5, 7, 11), dtype=jnp.float32)
    p2 = jax.random.normal(k2, (3, 5, 7, 11), dtype=jnp.float32)
    loss2 = jax.block_until_ready(mse_loss_pallas(p2, t2, min_kernel_bytes=0))
    ref2 = jnp.mean((p2 - t2) ** 2)
    assert jnp.allclose(loss2, ref2, rtol=1e-5, atol=1e-6), (loss2, ref2)

    # 4) Multi-step grid (forces small tiles) to exercise the accumulation,
    #    boundary masking and (on v7x) the two-partial split.
    t3 = jax.random.normal(k1, (2, 4, 128, 128), dtype=jnp.float32)
    p3 = jax.random.normal(k2, (2, 4, 128, 128), dtype=jnp.float32)
    loss3 = jax.block_until_ready(
        mse_loss_pallas(p3, t3, min_kernel_bytes=0,
                        target_tile_bytes=128 * 1024))
    ref3 = jnp.mean((p3 - t3) ** 2)
    assert jnp.allclose(loss3, ref3, rtol=1e-5, atol=1e-6), (loss3, ref3)

    print("KERNEL_OK")
</pallas_src>

<mosaic_0001>
module attributes {stable_mosaic.version = 11 : i64} {
  func.func @_mse_partial_kernel(%arg0: i32, %arg1: i32, %arg2: memref<16x128xf32, #tpu.memory_space<vmem>>, %arg3: memref<16x128xf32, #tpu.memory_space<vmem>>, %arg4: memref<1x8x128xf32, #tpu.memory_space<vmem>>, %arg5: memref<8x128xf32, #tpu.memory_space<vmem>>) attributes {dimension_semantics = [#tpu.dimension_semantics<parallel>, #tpu.dimension_semantics<arbitrary>], iteration_bounds = array<i64: 1, 1>, scalar_prefetch = 0 : i64, scratch_operands = 1 : i64, tpu.core_type = #tpu.core_type<tc>, window_params = [{transform_indices = @transform_0, window_bounds = array<i64: 16, 128>}, {transform_indices = @transform_1, window_bounds = array<i64: 16, 128>}, {transform_indices = @transform_2, window_bounds = array<i64: 1, 8, 128>}]} {
    %c0_i32 = arith.constant 0 : i32
    %0 = arith.cmpi eq, %arg1, %c0_i32 : i32
    %1 = arith.extui %0 : i1 to i32
    %c0_i32_0 = arith.constant 0 : i32
    %2 = arith.cmpi ne, %1, %c0_i32_0 : i32
    scf.if %2 {
      %cst = arith.constant 0.000000e+00 : f32
      %20 = vector.broadcast %cst : f32 to vector<8x128xf32>
      %c0_10 = arith.constant 0 : index
      %c0_11 = arith.constant 0 : index
      %21 = vector.load %arg5[%c0_10, %c0_11] : memref<8x128xf32, #tpu.memory_space<vmem>>, vector<8x128xf32>
      tpu.vector_store %arg5[%c0_10, %c0_11], %20 {strides = array<i32>} : memref<8x128xf32, #tpu.memory_space<vmem>>, vector<8x128xf32>,
    } else {
    }
    %c0 = arith.constant 0 : index
    %c0_1 = arith.constant 0 : index
    %3 = vector.load %arg2[%c0, %c0_1] : memref<16x128xf32, #tpu.memory_space<vmem>>, vector<16x128xf32>
    %c0_2 = arith.constant 0 : index
    %c0_3 = arith.constant 0 : index
    %4 = vector.load %arg3[%c0_2, %c0_3] : memref<16x128xf32, #tpu.memory_space<vmem>>, vector<16x128xf32>
    %5 = arith.subf %3, %4 : vector<16x128xf32>
    %6 = arith.mulf %5, %5 : vector<16x128xf32>
    %c1_i32 = arith.constant 1 : i32
    %7 = arith.muli %arg0, %c1_i32 : i32
    %8 = arith.addi %7, %arg1 : i32
    %c16_i32 = arith.constant 16 : i32
    %9 = arith.muli %8, %c16_i32 : i32
    %c16_i32_4 = arith.constant 16 : i32
    %10 = arith.addi %9, %c16_i32_4 : i32
    %c16_i32_5 = arith.constant 16 : i32
    %11 = arith.cmpi sgt, %10, %c16_i32_5 : i32
    %true = arith.constant true
    %12 = arith.xori %11, %true : i1
    %13 = arith.extui %12 : i1 to i32
    %c0_i32_6 = arith.constant 0 : i32
    %14 = arith.cmpi ne, %13, %c0_i32_6 : i32
    scf.if %14 {
      %c0_10 = arith.constant 0 : index
      %c0_11 = arith.constant 0 : index
      %20 = vector.load %arg5[%c0_10, %c0_11] : memref<8x128xf32, #tpu.memory_space<vmem>>, vector<8x128xf32>
      %21 = vector.shape_cast %6 : vector<16x128xf32> to vector<2x8x128xf32>
      %cst = arith.constant dense<0.000000e+00> : vector<8x128xf32>
      %22 = vector.multi_reduction <add>, %21, %cst [0] : vector<2x8x128xf32> to vector<8x128xf32>
      %23 = arith.addf %20, %22 : vector<8x128xf32>
      %c0_12 = arith.constant 0 : index
      %c0_13 = arith.constant 0 : index
      %24 = vector.load %arg5[%c0_12, %c0_13] : memref<8x128xf32, #tpu.memory_space<vmem>>, vector<8x128xf32>
      tpu.vector_store %arg5[%c0_12, %c0_13], %23 {strides = array<i32>} : memref<8x128xf32, #tpu.memory_space<vmem>>, vector<8x128xf32>,
    } else {
    }
    %15 = arith.extui %11 : i1 to i32
    %c0_i32_7 = arith.constant 0 : i32
    %16 = arith.cmpi ne, %15, %c0_i32_7 : i32
    scf.if %16 {
      %20 = tpu.iota {dimensions = array<i32: 0>} : vector<16x128xi32>
      %21 = vector.broadcast %9 : i32 to vector<16x128xi32>
      %22 = arith.addi %21, %20 : vector<16x128xi32>
      %23 = tpu.iota {dimensions = array<i32: 1>} : vector<16x128xi32>
      %c16_i32_10 = arith.constant 16 : i32
      %24 = vector.broadcast %c16_i32_10 : i32 to vector<16x128xi32>
      %25 = arith.cmpi slt, %22, %24 : vector<16x128xi32>
      %c16_i32_11 = arith.constant 16 : i32
      %26 = vector.broadcast %c16_i32_11 : i32 to vector<16x128xi32>
      %27 = arith.cmpi eq, %22, %26 : vector<16x128xi32>
      %c0_i32_12 = arith.constant 0 : i32
      %28 = vector.broadcast %c0_i32_12 : i32 to vector<16x128xi32>
      %29 = arith.cmpi slt, %23, %28 : vector<16x128xi32>
      %30 = arith.andi %27, %29 : vector<16x128xi1>
      %31 = arith.ori %25, %30 : vector<16x128xi1>
      %c0_13 = arith.constant 0 : index
      %c0_14 = arith.constant 0 : index
      %32 = vector.load %arg5[%c0_13, %c0_14] : memref<8x128xf32, #tpu.memory_space<vmem>>, vector<8x128xf32>
      %cst = arith.constant 0.000000e+00 : f32
      %33 = vector.broadcast %cst : f32 to vector<16x128xf32>
      %34 = arith.select %31, %6, %33 : vector<16x128xi1>, vector<16x128xf32>
      %35 = vector.shape_cast %34 : vector<16x128xf32> to vector<2x8x128xf32>
      %cst_15 = arith.constant dense<0.000000e+00> : vector<8x128xf32>
      %36 = vector.multi_reduction <add>, %35, %cst_15 [0] : vector<2x8x128xf32> to vector<8x128xf32>
      %37 = arith.addf %32, %36 : vector<8x128xf32>
      %c0_16 = arith.constant 0 : index
      %c0_17 = arith.constant 0 : index
      %38 = vector.load %arg5[%c0_16, %c0_17] : memref<8x128xf32, #tpu.memory_space<vmem>>, vector<8x128xf32>
      tpu.vector_store %arg5[%c0_16, %c0_17], %37 {strides = array<i32>} : memref<8x128xf32, #tpu.memory_space<vmem>>, vector<8x128xf32>,
    } else {
    }
    %c0_i32_8 = arith.constant 0 : i32
    %17 = arith.cmpi eq, %arg1, %c0_i32_8 : i32
    %18 = arith.extui %17 : i1 to i32
    %c0_i32_9 = arith.constant 0 : i32
    %19 = arith.cmpi ne, %18, %c0_i32_9 : i32
    scf.if %19 {
      %c0_10 = arith.constant 0 : index
      %c0_11 = arith.constant 0 : index
      %20 = vector.load %arg5[%c0_10, %c0_11] : memref<8x128xf32, #tpu.memory_space<vmem>>, vector<8x128xf32>
      %21 = vector.shape_cast %20 : vector<8x128xf32> to vector<1x8x128xf32>
      %c0_12 = arith.constant 0 : index
      %c0_13 = arith.constant 0 : index
      %c0_14 = arith.constant 0 : index
      %22 = vector.load %arg4[%c0_12, %c0_13, %c0_14] : memref<1x8x128xf32, #tpu.memory_space<vmem>>, vector<1x8x128xf32>
      tpu.vector_store %arg4[%c0_12, %c0_13, %c0_14], %21 {strides = array<i32>} : memref<1x8x128xf32, #tpu.memory_space<vmem>>, vector<1x8x128xf32>,
    } else {
    }
    return
  }
  func.func @transform_0(%arg0: i32, %arg1: i32) -> (i32, i32) {
    %c1_i32 = arith.constant 1 : i32
    %0 = arith.muli %arg0, %c1_i32 : i32
    %1 = arith.addi %0, %arg1 : i32
    %c0_i32 = arith.constant 0 : i32
    %c0_i32_0 = arith.constant 0 : i32
    return %1, %c0_i32 : i32, i32
  }
  func.func @transform_1(%arg0: i32, %arg1: i32) -> (i32, i32) {
    %c1_i32 = arith.constant 1 : i32
    %0 = arith.muli %arg0, %c1_i32 : i32
    %1 = arith.addi %0, %arg1 : i32
    %c0_i32 = arith.constant 0 : i32
    %c0_i32_0 = arith.constant 0 : i32
    return %1, %c0_i32 : i32, i32
  }
  func.func @transform_2(%arg0: i32, %arg1: i32) -> (i32, i32, i32) {
    %c0_i32 = arith.constant 0 : i32
    %c0_i32_0 = arith.constant 0 : i32
    %c0_i32_1 = arith.constant 0 : i32
    return %arg0, %c0_i32, %c0_i32_0 : i32, i32, i32
  }
}

</mosaic_0001>

<bundles_post_ra>
// kernel: tpu_custom_call.1
= control target key start
LH: loop header
LB: loop body
LE: loop exit
PB: predicated region body
PF: predicated region fallthrough
CT: control target
= control target key end

     0   :  { %7 = vsyncpa [#allocation4], 0  ;;  %s257_s0 = inlined_call_operand.hbm [shape: f32[16,128], index: 0, kind: input, shape index: {}]   ;;  %s258_s1 = inlined_call_operand.hbm [shape: f32[16,128], index: 1, kind: input, shape index: {}]   ;;  %s259_s2 = inlined_call_operand.hbm [shape: f32[1,8,128], index: 2, kind: output, shape index: {}]  }
   0x1   :  { %8 = vsyncpa [#allocation7], 0 }
   0x2   :  { %9 = vsyncpa [#allocation5], 0  ;;  %s201_s9 = smov [#allocation3]   ;;  %s129_s13 = scalar_lea.hbm %s257_s0, 256 }
   0x3   :  { %s19_s10 = sshll.u32 %s201_s9, 4  ;;  %p130_p0 = scmp.ne.s32.totalorder %s257_s0, %s129_s13  ;;  %s20_s10 = int_to_ptr.vmem [resolvable:$true] %s19_s10 }
   0x4   :  { %p133_p1 = scmp.lt.u32.totalorder %s129_s13, %s257_s0 }
   0x6   :  { %p135_p2 = pnand %p133_p1, %p130_p0 }
   0x8   :  { %138 = shalt.err (!%p135_p2)
}
   0x9   :  { %s139_s18 = scalar_lea.vmem %s20_s10, 256  ;;  %p144_p4 = scmp.lt.s32.totalorder %s20_s10, %s20_s10 }
   0xa   :  { %p140_p3 = scmp.ne.s32.totalorder %s20_s10, %s139_s18  ;;  %p145_p5 = scmp.lt.s32.totalorder %s139_s18, %s139_s18 }
   0xc   :  { %p146_p6 = por %p145_p5, %p144_p4 }
   0xe   :  { %p147_p7 = pnand %p146_p6, %p140_p3 }
  0x10   :  { %150 = shalt.err (!%p147_p7)
}
  0x11   :  { %s202_s19 = smov 128   ;;  %s203_s20 = smov 8  }
  0x12   :  { %25 = dma.hbm_to_vmem [thread:$0]  %s257_s0, 256, %s20_s10, [#allocation4], %s202_s19, %s202_s19, %s203_s20  }
  0x13   :  { %s204_s23 = smov [#allocation6]   ;;  %s151_s27 = scalar_lea.hbm %s258_s1, 256 }
  0x14   :  { %s35_s24 = sshll.u32 %s204_s23, 4  ;;  %p152_p8 = scmp.ne.s32.totalorder %s258_s1, %s151_s27  ;;  %s36_s24 = int_to_ptr.vmem [resolvable:$true] %s35_s24 }
  0x15   :  { %p155_p9 = scmp.lt.u32.totalorder %s151_s27, %s258_s1 }
  0x17   :  { %p157_p10 = pnand %p155_p9, %p152_p8 }
  0x19   :  { %160 = shalt.err (!%p157_p10)
}
  0x1a   :  { %s161_s4 = scalar_lea.vmem %s36_s24, 256  ;;  %p166_p12 = scmp.lt.s32.totalorder %s36_s24, %s36_s24 }
  0x1b   :  { %p162_p11 = scmp.ne.s32.totalorder %s36_s24, %s161_s4  ;;  %p167_p13 = scmp.lt.s32.totalorder %s161_s4, %s161_s4 }
  0x1d   :  { %p168_p0 = por %p167_p13, %p166_p12 }
  0x1f   :  { %p169_p1 = pnand %p168_p0, %p162_p11 }
  0x21   :  { %172 = shalt.err (!%p169_p1)
}
  0x22   :  { %41 = dma.hbm_to_vmem [thread:$0]  %s258_s1, 256, %s36_s24, [#allocation7], %s202_s19, %s202_s19, %s203_s20  }
  0x23   :  { %195 = dma.done.wait [#allocation4], 256  }
  0x24   :  { %196 = vsyncadd [#allocation4], 4294967040 }
  0x25   :  { %197 = dma.done.wait [#allocation7], 256  }
  0x26   :  { %198 = vsyncadd [#allocation7], 4294967040  ;;  %v57_v0 = vld [vmem:[#allocation3] sm:$0xff]  ;;  %v58_v1 = vld [vmem:[#allocation3 + $0x8] sm:$0xff]  ;;  %s205_s6 = smov [#allocation8]  }
  0x27   :  { %v59_v2 = vld [vmem:[#allocation6] sm:$0xff]  ;;  %v60_v3 = vld [vmem:[#allocation6 + $0x8] sm:$0xff]  ;;  %s114_s7 = sshll.u32 %s205_s6, 4  ;;  %s115_s7 = int_to_ptr.vmem [resolvable:$true] %s114_s7 }
  0x28   :  { %v61_v4 = vsub.f32 %v57_v0, %v59_v2  ;;  %v62_v5 = vsub.f32 %v58_v1, %v60_v3  ;;  %s173_s8 = scalar_lea.vmem %s115_s7, 128  ;;  %p178_p3 = scmp.lt.s32.totalorder %s115_s7, %s115_s7 }
  0x29   :  { %p174_p2 = scmp.ne.s32.totalorder %s115_s7, %s173_s8  ;;  %p179_p4 = scmp.lt.s32.totalorder %s173_s8, %s173_s8 }
  0x2a   :  { %v63_v6 = vmul.f32 %v61_v4, %v61_v4  ;;  %v64_v7 = vmul.f32 %v62_v5, %v62_v5 }
  0x2b   :  { %p180_p5 = por %p179_p4, %p178_p3 }
  0x2c   :  { %v74_v8 = vadd.f32 %v64_v7, %v63_v6 }
  0x2d   :  { %p181_p6 = pnand %p180_p5, %p174_p2 }
  0x2e   :  { %107 = vst [vmem:[#allocation8] sm:$0xff] %v74_v8 }
  0x2f   :  { %184 = shalt.err (!%p181_p6)
}
  0x30   :  { %s185_s10 = scalar_lea.hbm %s259_s2, 128 }
  0x31   :  { %p186_p7 = scmp.ne.s32.totalorder %s259_s2, %s185_s10  ;;  %p189_p8 = scmp.lt.u32.totalorder %s185_s10, %s259_s2 }
  0x33   :  { %p191_p9 = pnand %p189_p8, %p186_p7 }
  0x35   :  { %194 = shalt.err (!%p191_p9)
}
  0x36   :  { %117 = dma.vmem_to_hbm [thread:$0]  %s115_s7, 128, %s259_s2, [#allocation5]  }
  0x37   :  { %199 = dma.done.wait [#allocation5], 128  }
  0x38   :  { %200 = vsyncadd [#allocation5], 4294967168 }
  0x39   :  { %121 = vsyncpa [#allocation4], 1 }
  0x3a   :  { %122 = vsyncpa [#allocation7], 1 }
  0x3b   :  { %123 = vsyncpa [#allocation5], 1 }

</bundles_post_ra>
